<compile_context>
chip_gen: v6e
topology: v6e:2x2x1
jax: 0.10.0
libtpu: 0.0.40
codegen_flags: <defaults>
</compile_context>

<pallas_src>
import functools

import jax
import jax.numpy as jnp
from jax.experimental import pallas as pl
from jax.experimental.pallas import tpu as pltpu


def _round_up(x, m):
    return ((x + m - 1) // m) * m


def _fused_conv_kernel(xl_ref, xr_ref, wl_ref, wr_ref, bl_ref, br_ref,
                       ol_ref, or_ref, *, ksize, w_padded, n_cols, act):
    """One grid step = one image, both branches.

    xl_ref/xr_ref : (1, Cin, Lp)       zero-padded image, spatially flattened
    wl_ref/wr_ref : (K*K, Cout, Cin)   conv taps, tap-major
    bl_ref/br_ref : (Cout, 1)
    ol_ref/or_ref : (1, Cout, S)       stride-1 output in flattened padded space
    """

    def one_branch(x_ref, w_ref, b_ref, o_ref):
        cout = o_ref.shape[1]
        acc = jnp.zeros((cout, n_cols), jnp.float32)
        # 9 shifted lane-dense slices, each contracted over Cin on the MXU.
        for kh in range(ksize):
            for kw in range(ksize):
                off = kh * w_padded + kw
                xs = x_ref[0, :, off:off + n_cols]          # (Cin, S)
                acc = acc + jnp.dot(w_ref[kh * ksize + kw], xs,
                                    preferred_element_type=jnp.float32)
        acc = acc + b_ref[...].astype(jnp.float32)          # (Cout, 1) broadcast
        if act:
            # sigmoid: exp on the EUP, approximate reciprocal (also EUP slot).
            acc = pl.reciprocal(1.0 + jnp.exp(-acc), approx=True)
        o_ref[0] = acc.astype(o_ref.dtype)

    one_branch(xl_ref, wl_ref, bl_ref, ol_ref)
    one_branch(xr_ref, wr_ref, br_ref, or_ref)


@functools.partial(jax.jit, static_argnames=("ksize", "padding", "stride", "act"))
def ytmt_out_forward(x_l, x_r, w_l, b_l, w_r, b_r, *, ksize, padding, stride, act):
    """Fused forward of both conv+sigmoid branches.  Inputs/outputs are NCHW."""
    n, cin, h, w = x_l.shape
    cout_l = w_l.shape[0]
    cout_r = w_r.shape[0]

    hp = h + 2 * padding                 # padded spatial dims
    wp = w + 2 * padding
    ho1 = hp - ksize + 1                 # stride-1 output extents
    wo1 = wp - ksize + 1
    s = ho1 * wp                         # columns computed per (image, channel)
    # Flattened input length: must cover the largest shifted read; round up to
    # a multiple of 128 so the lane dim is dense/aligned.
    lp = _round_up(max(hp * wp + ksize - 1, 128), 128)

    def flat_pad(x):
        xp = jnp.pad(x, ((0, 0), (0, 0), (padding, padding), (padding, padding)))
        xf = xp.reshape(n, cin, hp * wp)
        return jnp.pad(xf, ((0, 0), (0, 0), (0, lp - hp * wp)))

    xl = flat_pad(x_l)                   # (N, Cin, Lp)
    xr = flat_pad(x_r)

    def taps(wgt):                       # (Cout, Cin, K, K) -> (K*K, Cout, Cin)
        return jnp.transpose(wgt, (2, 3, 0, 1)).reshape(
            ksize * ksize, wgt.shape[0], cin)

    wl_t = taps(w_l)
    wr_t = taps(w_r)
    bl = b_l.reshape(cout_l, 1)
    br = b_r.reshape(cout_r, 1)

    kern = functools.partial(_fused_conv_kernel, ksize=ksize, w_padded=wp,
                             n_cols=s, act=act)

    out_l_flat, out_r_flat = pl.pallas_call(
        kern,
        out_shape=(jax.ShapeDtypeStruct((n, cout_l, s), x_l.dtype),
                   jax.ShapeDtypeStruct((n, cout_r, s), x_r.dtype)),
        grid_spec=pltpu.PrefetchScalarGridSpec(
            num_scalar_prefetch=0,
            grid=(n,),                                       # >= 2 steps in demo
            in_specs=[
                pl.BlockSpec((1, cin, lp), lambda i: (i, 0, 0)),
                pl.BlockSpec((1, cin, lp), lambda i: (i, 0, 0)),
                pl.BlockSpec((ksize * ksize, cout_l, cin), lambda i: (0, 0, 0)),
                pl.BlockSpec((ksize * ksize, cout_r, cin), lambda i: (0, 0, 0)),
                pl.BlockSpec((cout_l, 1), lambda i: (0, 0)),
                pl.BlockSpec((cout_r, 1), lambda i: (0, 0)),
            ],
            out_specs=(
                pl.BlockSpec((1, cout_l, s), lambda i: (i, 0, 0)),
                pl.BlockSpec((1, cout_r, s), lambda i: (i, 0, 0)),
            ),
        ),
        compiler_params=pltpu.CompilerParams(
            dimension_semantics=("parallel",)),
    )(xl, xr, wl_t, wr_t, bl, br)

    def finish(of, cout):
        # (N, Cout, Ho1*Wp) -> (N, Cout, Ho1, Wp) -> drop garbage columns, then
        # apply stride by subsampling the stride-1 result.  No transpose needed.
        y = of.reshape(n, cout, ho1, wp)[:, :, :, :wo1]
        if stride != 1:
            y = y[:, :, ::stride, ::stride]
        return y

    return finish(out_l_flat, cout_l), finish(out_r_flat, cout_r)


class YTMTOutBlockPallas:
    """JAX/Pallas port of YTMTOutBlock (two parallel conv+sigmoid branches)."""

    def __init__(self, key, in_channels=3, out_channels=3, kernel_size=3,
                 padding=None, stride=1, bias=True, act=True):
        if isinstance(out_channels, int):
            out_l = out_r = out_channels
        else:
            out_l, out_r = out_channels
        self.padding = padding or (kernel_size - 1) // 2
        self.stride = stride
        self.ksize = kernel_size
        self.act = act

        # Deterministic init mimicking torch's default conv init (U(-b, b)).
        fan_in = in_channels * kernel_size * kernel_size
        bound = (1.0 / fan_in) ** 0.5
        k0, k1, k2, k3 = jax.random.split(key, 4)
        wshape_l = (out_l, in_channels, kernel_size, kernel_size)
        wshape_r = (out_r, in_channels, kernel_size, kernel_size)
        self.w_l = jax.random.uniform(k0, wshape_l, jnp.float32, -bound, bound)
        self.w_r = jax.random.uniform(k2, wshape_r, jnp.float32, -bound, bound)
        if bias:
            self.b_l = jax.random.uniform(k1, (out_l,), jnp.float32, -bound, bound)
            self.b_r = jax.random.uniform(k3, (out_r,), jnp.float32, -bound, bound)
        else:
            self.b_l = jnp.zeros((out_l,), jnp.float32)
            self.b_r = jnp.zeros((out_r,), jnp.float32)

    def __call__(self, input_l, input_r):
        return ytmt_out_forward(
            input_l, input_r, self.w_l, self.b_l, self.w_r, self.b_r,
            ksize=self.ksize, padding=self.padding, stride=self.stride,
            act=self.act)


def _conv_reference(x, w, b, padding, stride, act):
    y = jax.lax.conv_general_dilated(
        x, w, window_strides=(stride, stride),
        padding=((padding, padding), (padding, padding)),
        dimension_numbers=("NCHW", "OIHW", "NCHW"),
        precision=jax.lax.Precision.HIGHEST)
    y = y + b.reshape(1, -1, 1, 1)
    return jax.nn.sigmoid(y) if act else y


if __name__ == "__main__":
    key = jax.random.PRNGKey(0)
    k_params, k_l, k_r = jax.random.split(key, 3)

    N, CIN, H, W = 2, 3, 16, 16
    input_l = jax.random.normal(k_l, (N, CIN, H, W), jnp.float32)
    input_r = jax.random.normal(k_r, (N, CIN, H, W), jnp.float32)

    block = YTMTOutBlockPallas(k_params, in_channels=CIN, out_channels=3,
                               kernel_size=3, bias=True, act=True)

    out_l, out_r = block(input_l, input_r)
    out_l = jax.block_until_ready(out_l)
    out_r = jax.block_until_ready(out_r)

    # Sanity check against XLA's conv (tolerance accounts for the approximate
    # EUP reciprocal in the sigmoid epilogue).
    ref_l = _conv_reference(input_l, block.w_l, block.b_l, block.padding,
                            block.stride, block.act)
    ref_r = _conv_reference(input_r, block.w_r, block.b_r, block.padding,
                            block.stride, block.act)
    assert out_l.shape == (N, 3, H, W) and out_r.shape == (N, 3, H, W)
    assert jnp.allclose(out_l, ref_l, atol=5e-3, rtol=5e-3)
    assert jnp.allclose(out_r, ref_r, atol=5e-3, rtol=5e-3)

    print("KERNEL_OK")
</pallas_src>

<mosaic_0001>
module attributes {stable_mosaic.version = 11 : i64} {
  func.func @_fused_conv_kernel(%arg0: i32, %arg1: memref<1x3x384xf32, #tpu.memory_space<vmem>>, %arg2: memref<1x3x384xf32, #tpu.memory_space<vmem>>, %arg3: memref<9x3x3xf32, #tpu.memory_space<vmem>>, %arg4: memref<9x3x3xf32, #tpu.memory_space<vmem>>, %arg5: memref<3x1xf32, #tpu.memory_space<vmem>>, %arg6: memref<3x1xf32, #tpu.memory_space<vmem>>, %arg7: memref<1x3x288xf32, #tpu.memory_space<vmem>>, %arg8: memref<1x3x288xf32, #tpu.memory_space<vmem>>) attributes {dimension_semantics = [#tpu.dimension_semantics<parallel>], iteration_bounds = array<i64: 2>, scalar_prefetch = 0 : i64, scratch_operands = 0 : i64, tpu.core_type = #tpu.core_type<tc>, window_params = [{transform_indices = @transform_0, window_bounds = array<i64: 1, 3, 384>}, {transform_indices = @transform_1, window_bounds = array<i64: 1, 3, 384>}, {pipeline_mode = #tpu.pipeline_mode<synchronous>, transform_indices = @transform_2, window_bounds = array<i64: 9, 3, 3>}, {pipeline_mode = #tpu.pipeline_mode<synchronous>, transform_indices = @transform_3, window_bounds = array<i64: 9, 3, 3>}, {pipeline_mode = #tpu.pipeline_mode<synchronous>, transform_indices = @transform_4, window_bounds = array<i64: 3, 1>}, {pipeline_mode = #tpu.pipeline_mode<synchronous>, transform_indices = @transform_5, window_bounds = array<i64: 3, 1>}, {transform_indices = @transform_6, window_bounds = array<i64: 1, 3, 288>}, {transform_indices = @transform_7, window_bounds = array<i64: 1, 3, 288>}]} {
    %cst = arith.constant 0.000000e+00 : f32
    %0 = vector.broadcast %cst : f32 to vector<3x288xf32>
    %c0 = arith.constant 0 : index
    %c0_0 = arith.constant 0 : index
    %c0_1 = arith.constant 0 : index
    %1 = vector.load %arg1[%c0, %c0_0, %c0_1] : memref<1x3x384xf32, #tpu.memory_space<vmem>>, vector<1x3x288xf32>
    %2 = vector.shape_cast %1 : vector<1x3x288xf32> to vector<3x288xf32>
    %c0_2 = arith.constant 0 : index
    %c0_3 = arith.constant 0 : index
    %c0_4 = arith.constant 0 : index
    %3 = vector.load %arg3[%c0_2, %c0_3, %c0_4] : memref<9x3x3xf32, #tpu.memory_space<vmem>>, vector<1x3x3xf32>
    %4 = vector.shape_cast %3 : vector<1x3x3xf32> to vector<3x3xf32>
    %cst_5 = arith.constant dense<0.000000e+00> : vector<3x288xf32>
    %5 = tpu.matmul %4, %2, %cst_5 {dimension_numbers = #tpu.dot_dimension_numbers<[1], [0], [0], [1], [0, 0, 1, 1], [], []>} : vector<3x3xf32>, vector<3x288xf32>, vector<3x288xf32> -> vector<3x288xf32>
    %6 = arith.addf %0, %5 : vector<3x288xf32>
    %c0_6 = arith.constant 0 : index
    %c0_7 = arith.constant 0 : index
    %c1 = arith.constant 1 : index
    %7 = vector.load %arg1[%c0_6, %c0_7, %c1] : memref<1x3x384xf32, #tpu.memory_space<vmem>>, vector<1x3x288xf32>
    %8 = vector.shape_cast %7 : vector<1x3x288xf32> to vector<3x288xf32>
    %c1_8 = arith.constant 1 : index
    %c0_9 = arith.constant 0 : index
    %c0_10 = arith.constant 0 : index
    %9 = vector.load %arg3[%c1_8, %c0_9, %c0_10] : memref<9x3x3xf32, #tpu.memory_space<vmem>>, vector<1x3x3xf32>
    %10 = vector.shape_cast %9 : vector<1x3x3xf32> to vector<3x3xf32>
    %cst_11 = arith.constant dense<0.000000e+00> : vector<3x288xf32>
    %11 = tpu.matmul %10, %8, %cst_11 {dimension_numbers = #tpu.dot_dimension_numbers<[1], [0], [0], [1], [0, 0, 1, 1], [], []>} : vector<3x3xf32>, vector<3x288xf32>, vector<3x288xf32> -> vector<3x288xf32>
    %12 = arith.addf %6, %11 : vector<3x288xf32>
    %c0_12 = arith.constant 0 : index
    %c0_13 = arith.constant 0 : index
    %c2 = arith.constant 2 : index
    %13 = vector.load %arg1[%c0_12, %c0_13, %c2] : memref<1x3x384xf32, #tpu.memory_space<vmem>>, vector<1x3x288xf32>
    %14 = vector.shape_cast %13 : vector<1x3x288xf32> to vector<3x288xf32>
    %c2_14 = arith.constant 2 : index
    %c0_15 = arith.constant 0 : index
    %c0_16 = arith.constant 0 : index
    %15 = vector.load %arg3[%c2_14, %c0_15, %c0_16] : memref<9x3x3xf32, #tpu.memory_space<vmem>>, vector<1x3x3xf32>
    %16 = vector.shape_cast %15 : vector<1x3x3xf32> to vector<3x3xf32>
    %cst_17 = arith.constant dense<0.000000e+00> : vector<3x288xf32>
    %17 = tpu.matmul %16, %14, %cst_17 {dimension_numbers = #tpu.dot_dimension_numbers<[1], [0], [0], [1], [0, 0, 1, 1], [], []>} : vector<3x3xf32>, vector<3x288xf32>, vector<3x288xf32> -> vector<3x288xf32>
    %18 = arith.addf %12, %17 : vector<3x288xf32>
    %c0_18 = arith.constant 0 : index
    %c0_19 = arith.constant 0 : index
    %c18 = arith.constant 18 : index
    %19 = vector.load %arg1[%c0_18, %c0_19, %c18] : memref<1x3x384xf32, #tpu.memory_space<vmem>>, vector<1x3x288xf32>
    %20 = vector.shape_cast %19 : vector<1x3x288xf32> to vector<3x288xf32>
    %c3 = arith.constant 3 : index
    %c0_20 = arith.constant 0 : index
    %c0_21 = arith.constant 0 : index
    %21 = vector.load %arg3[%c3, %c0_20, %c0_21] : memref<9x3x3xf32, #tpu.memory_space<vmem>>, vector<1x3x3xf32>
    %22 = vector.shape_cast %21 : vector<1x3x3xf32> to vector<3x3xf32>
    %cst_22 = arith.constant dense<0.000000e+00> : vector<3x288xf32>
    %23 = tpu.matmul %22, %20, %cst_22 {dimension_numbers = #tpu.dot_dimension_numbers<[1], [0], [0], [1], [0, 0, 1, 1], [], []>} : vector<3x3xf32>, vector<3x288xf32>, vector<3x288xf32> -> vector<3x288xf32>
    %24 = arith.addf %18, %23 : vector<3x288xf32>
    %c0_23 = arith.constant 0 : index
    %c0_24 = arith.constant 0 : index
    %c19 = arith.constant 19 : index
    %25 = vector.load %arg1[%c0_23, %c0_24, %c19] : memref<1x3x384xf32, #tpu.memory_space<vmem>>, vector<1x3x288xf32>
    %26 = vector.shape_cast %25 : vector<1x3x288xf32> to vector<3x288xf32>
    %c4 = arith.constant 4 : index
    %c0_25 = arith.constant 0 : index
    %c0_26 = arith.constant 0 : index
    %27 = vector.load %arg3[%c4, %c0_25, %c0_26] : memref<9x3x3xf32, #tpu.memory_space<vmem>>, vector<1x3x3xf32>
    %28 = vector.shape_cast %27 : vector<1x3x3xf32> to vector<3x3xf32>
    %cst_27 = arith.constant dense<0.000000e+00> : vector<3x288xf32>
    %29 = tpu.matmul %28, %26, %cst_27 {dimension_numbers = #tpu.dot_dimension_numbers<[1], [0], [0], [1], [0, 0, 1, 1], [], []>} : vector<3x3xf32>, vector<3x288xf32>, vector<3x288xf32> -> vector<3x288xf32>
    %30 = arith.addf %24, %29 : vector<3x288xf32>
    %c0_28 = arith.constant 0 : index
    %c0_29 = arith.constant 0 : index
    %c20 = arith.constant 20 : index
    %31 = vector.load %arg1[%c0_28, %c0_29, %c20] : memref<1x3x384xf32, #tpu.memory_space<vmem>>, vector<1x3x288xf32>
    %32 = vector.shape_cast %31 : vector<1x3x288xf32> to vector<3x288xf32>
    %c5 = arith.constant 5 : index
    %c0_30 = arith.constant 0 : index
    %c0_31 = arith.constant 0 : index
    %33 = vector.load %arg3[%c5, %c0_30, %c0_31] : memref<9x3x3xf32, #tpu.memory_space<vmem>>, vector<1x3x3xf32>
    %34 = vector.shape_cast %33 : vector<1x3x3xf32> to vector<3x3xf32>
    %cst_32 = arith.constant dense<0.000000e+00> : vector<3x288xf32>
    %35 = tpu.matmul %34, %32, %cst_32 {dimension_numbers = #tpu.dot_dimension_numbers<[1], [0], [0], [1], [0, 0, 1, 1], [], []>} : vector<3x3xf32>, vector<3x288xf32>, vector<3x288xf32> -> vector<3x288xf32>
    %36 = arith.addf %30, %35 : vector<3x288xf32>
    %c0_33 = arith.constant 0 : index
    %c0_34 = arith.constant 0 : index
    %c36 = arith.constant 36 : index
    %37 = vector.load %arg1[%c0_33, %c0_34, %c36] : memref<1x3x384xf32, #tpu.memory_space<vmem>>, vector<1x3x288xf32>
    %38 = vector.shape_cast %37 : vector<1x3x288xf32> to vector<3x288xf32>
    %c6 = arith.constant 6 : index
    %c0_35 = arith.constant 0 : index
    %c0_36 = arith.constant 0 : index
    %39 = vector.load %arg3[%c6, %c0_35, %c0_36] : memref<9x3x3xf32, #tpu.memory_space<vmem>>, vector<1x3x3xf32>
    %40 = vector.shape_cast %39 : vector<1x3x3xf32> to vector<3x3xf32>
    %cst_37 = arith.constant dense<0.000000e+00> : vector<3x288xf32>
    %41 = tpu.matmul %40, %38, %cst_37 {dimension_numbers = #tpu.dot_dimension_numbers<[1], [0], [0], [1], [0, 0, 1, 1], [], []>} : vector<3x3xf32>, vector<3x288xf32>, vector<3x288xf32> -> vector<3x288xf32>
    %42 = arith.addf %36, %41 : vector<3x288xf32>
    %c0_38 = arith.constant 0 : index
    %c0_39 = arith.constant 0 : index
    %c37 = arith.constant 37 : index
    %43 = vector.load %arg1[%c0_38, %c0_39, %c37] : memref<1x3x384xf32, #tpu.memory_space<vmem>>, vector<1x3x288xf32>
    %44 = vector.shape_cast %43 : vector<1x3x288xf32> to vector<3x288xf32>
    %c7 = arith.constant 7 : index
    %c0_40 = arith.constant 0 : index
    %c0_41 = arith.constant 0 : index
    %45 = vector.load %arg3[%c7, %c0_40, %c0_41] : memref<9x3x3xf32, #tpu.memory_space<vmem>>, vector<1x3x3xf32>
    %46 = vector.shape_cast %45 : vector<1x3x3xf32> to vector<3x3xf32>
    %cst_42 = arith.constant dense<0.000000e+00> : vector<3x288xf32>
    %47 = tpu.matmul %46, %44, %cst_42 {dimension_numbers = #tpu.dot_dimension_numbers<[1], [0], [0], [1], [0, 0, 1, 1], [], []>} : vector<3x3xf32>, vector<3x288xf32>, vector<3x288xf32> -> vector<3x288xf32>
    %48 = arith.addf %42, %47 : vector<3x288xf32>
    %c0_43 = arith.constant 0 : index
    %c0_44 = arith.constant 0 : index
    %c38 = arith.constant 38 : index
    %49 = vector.load %arg1[%c0_43, %c0_44, %c38] : memref<1x3x384xf32, #tpu.memory_space<vmem>>, vector<1x3x288xf32>
    %50 = vector.shape_cast %49 : vector<1x3x288xf32> to vector<3x288xf32>
    %c8 = arith.constant 8 : index
    %c0_45 = arith.constant 0 : index
    %c0_46 = arith.constant 0 : index
    %51 = vector.load %arg3[%c8, %c0_45, %c0_46] : memref<9x3x3xf32, #tpu.memory_space<vmem>>, vector<1x3x3xf32>
    %52 = vector.shape_cast %51 : vector<1x3x3xf32> to vector<3x3xf32>
    %cst_47 = arith.constant dense<0.000000e+00> : vector<3x288xf32>
    %53 = tpu.matmul %52, %50, %cst_47 {dimension_numbers = #tpu.dot_dimension_numbers<[1], [0], [0], [1], [0, 0, 1, 1], [], []>} : vector<3x3xf32>, vector<3x288xf32>, vector<3x288xf32> -> vector<3x288xf32>
    %54 = arith.addf %48, %53 : vector<3x288xf32>
    %c0_48 = arith.constant 0 : index
    %c0_49 = arith.constant 0 : index
    %55 = vector.load %arg5[%c0_48, %c0_49] : memref<3x1xf32, #tpu.memory_space<vmem>>, vector<3x1xf32>
    %56 = vector.broadcast %55 : vector<3x1xf32> to vector<3x288xf32>
    %57 = arith.addf %54, %56 : vector<3x288xf32>
    %cst_50 = arith.constant 0.000000e+00 : f32
    %58 = vector.broadcast %cst_50 : f32 to vector<3x288xf32>
    %59 = arith.subf %58, %57 : vector<3x288xf32>
    %60 = math.exp %59 : vector<3x288xf32>
    %cst_51 = arith.constant 1.000000e+00 : f32
    %61 = vector.broadcast %cst_51 : f32 to vector<3x288xf32>
    %62 = arith.addf %61, %60 : vector<3x288xf32>
    %63 = tpu.reciprocal %62 {approx = true} : vector<3x288xf32> -> vector<3x288xf32>
    %c0_52 = arith.constant 0 : index
    %c0_53 = arith.constant 0 : index
    %c0_54 = arith.constant 0 : index
    %64 = vector.load %arg7[%c0_52, %c0_53, %c0_54] : memref<1x3x288xf32, #tpu.memory_space<vmem>>, vector<1x3x288xf32>
    %65 = vector.shape_cast %64 : vector<1x3x288xf32> to vector<3x288xf32>
    %66 = vector.shape_cast %63 : vector<3x288xf32> to vector<1x3x288xf32>
    tpu.vector_store %arg7[%c0_52, %c0_53, %c0_54], %66 {strides = array<i32>} : memref<1x3x288xf32, #tpu.memory_space<vmem>>, vector<1x3x288xf32>,
    %cst_55 = arith.constant 0.000000e+00 : f32
    %67 = vector.broadcast %cst_55 : f32 to vector<3x288xf32>
    %c0_56 = arith.constant 0 : index
    %c0_57 = arith.constant 0 : index
    %c0_58 = arith.constant 0 : index
    %68 = vector.load %arg2[%c0_56, %c0_57, %c0_58] : memref<1x3x384xf32, #tpu.memory_space<vmem>>, vector<1x3x288xf32>
    %69 = vector.shape_cast %68 : vector<1x3x288xf32> to vector<3x288xf32>
    %c0_59 = arith.constant 0 : index
    %c0_60 = arith.constant 0 : index
    %c0_61 = arith.constant 0 : index
    %70 = vector.load %arg4[%c0_59, %c0_60, %c0_61] : memref<9x3x3xf32, #tpu.memory_space<vmem>>, vector<1x3x3xf32>
    %71 = vector.shape_cast %70 : vector<1x3x3xf32> to vector<3x3xf32>
    %cst_62 = arith.constant dense<0.000000e+00> : vector<3x288xf32>
    %72 = tpu.matmul %71, %69, %cst_62 {dimension_numbers = #tpu.dot_dimension_numbers<[1], [0], [0], [1], [0, 0, 1, 1], [], []>} : vector<3x3xf32>, vector<3x288xf32>, vector<3x288xf32> -> vector<3x288xf32>
    %73 = arith.addf %67, %72 : vector<3x288xf32>
    %c0_63 = arith.constant 0 : index
    %c0_64 = arith.constant 0 : index
    %c1_65 = arith.constant 1 : index
    %74 = vector.load %arg2[%c0_63, %c0_64, %c1_65] : memref<1x3x384xf32, #tpu.memory_space<vmem>>, vector<1x3x288xf32>
    %75 = vector.shape_cast %74 : vector<1x3x288xf32> to vector<3x288xf32>
    %c1_66 = arith.constant 1 : index
    %c0_67 = arith.constant 0 : index
    %c0_68 = arith.constant 0 : index
    %76 = vector.load %arg4[%c1_66, %c0_67, %c0_68] : memref<9x3x3xf32, #tpu.memory_space<vmem>>, vector<1x3x3xf32>
    %77 = vector.shape_cast %76 : vector<1x3x3xf32> to vector<3x3xf32>
    %cst_69 = arith.constant dense<0.000000e+00> : vector<3x288xf32>
    %78 = tpu.matmul %77, %75, %cst_69 {dimension_numbers = #tpu.dot_dimension_numbers<[1], [0], [0], [1], [0, 0, 1, 1], [], []>} : vector<3x3xf32>, vector<3x288xf32>, vector<3x288xf32> -> vector<3x288xf32>
    %79 = arith.addf %73, %78 : vector<3x288xf32>
    %c0_70 = arith.constant 0 : index
    %c0_71 = arith.constant 0 : index
    %c2_72 = arith.constant 2 : index
    %80 = vector.load %arg2[%c0_70, %c0_71, %c2_72] : memref<1x3x384xf32, #tpu.memory_space<vmem>>, vector<1x3x288xf32>
    %81 = vector.shape_cast %80 : vector<1x3x288xf32> to vector<3x288xf32>
    %c2_73 = arith.constant 2 : index
    %c0_74 = arith.constant 0 : index
    %c0_75 = arith.constant 0 : index
    %82 = vector.load %arg4[%c2_73, %c0_74, %c0_75] : memref<9x3x3xf32, #tpu.memory_space<vmem>>, vector<1x3x3xf32>
    %83 = vector.shape_cast %82 : vector<1x3x3xf32> to vector<3x3xf32>
    %cst_76 = arith.constant dense<0.000000e+00> : vector<3x288xf32>
    %84 = tpu.matmul %83, %81, %cst_76 {dimension_numbers = #tpu.dot_dimension_numbers<[1], [0], [0], [1], [0, 0, 1, 1], [], []>} : vector<3x3xf32>, vector<3x288xf32>, vector<3x288xf32> -> vector<3x288xf32>
    %85 = arith.addf %79, %84 : vector<3x288xf32>
    %c0_77 = arith.constant 0 : index
    %c0_78 = arith.constant 0 : index
    %c18_79 = arith.constant 18 : index
    %86 = vector.load %arg2[%c0_77, %c0_78, %c18_79] : memref<1x3x384xf32, #tpu.memory_space<vmem>>, vector<1x3x288xf32>
    %87 = vector.shape_cast %86 : vector<1x3x288xf32> to vector<3x288xf32>
    %c3_80 = arith.constant 3 : index
    %c0_81 = arith.constant 0 : index
    %c0_82 = arith.constant 0 : index
    %88 = vector.load %arg4[%c3_80, %c0_81, %c0_82] : memref<9x3x3xf32, #tpu.memory_space<vmem>>, vector<1x3x3xf32>
    %89 = vector.shape_cast %88 : vector<1x3x3xf32> to vector<3x3xf32>
    %cst_83 = arith.constant dense<0.000000e+00> : vector<3x288xf32>
    %90 = tpu.matmul %89, %87, %cst_83 {dimension_numbers = #tpu.dot_dimension_numbers<[1], [0], [0], [1], [0, 0, 1, 1], [], []>} : vector<3x3xf32>, vector<3x288xf32>, vector<3x288xf32> -> vector<3x288xf32>
    %91 = arith.addf %85, %90 : vector<3x288xf32>
    %c0_84 = arith.constant 0 : index
    %c0_85 = arith.constant 0 : index
    %c19_86 = arith.constant 19 : index
    %92 = vector.load %arg2[%c0_84, %c0_85, %c19_86] : memref<1x3x384xf32, #tpu.memory_space<vmem>>, vector<1x3x288xf32>
    %93 = vector.shape_cast %92 : vector<1x3x288xf32> to vector<3x288xf32>
    %c4_87 = arith.constant 4 : index
    %c0_88 = arith.constant 0 : index
    %c0_89 = arith.constant 0 : index
    %94 = vector.load %arg4[%c4_87, %c0_88, %c0_89] : memref<9x3x3xf32, #tpu.memory_space<vmem>>, vector<1x3x3xf32>
    %95 = vector.shape_cast %94 : vector<1x3x3xf32> to vector<3x3xf32>
    %cst_90 = arith.constant dense<0.000000e+00> : vector<3x288xf32>
    %96 = tpu.matmul %95, %93, %cst_90 {dimension_numbers = #tpu.dot_dimension_numbers<[1], [0], [0], [1], [0, 0, 1, 1], [], []>} : vector<3x3xf32>, vector<3x288xf32>, vector<3x288xf32> -> vector<3x288xf32>
    %97 = arith.addf %91, %96 : vector<3x288xf32>
    %c0_91 = arith.constant 0 : index
    %c0_92 = arith.constant 0 : index
    %c20_93 = arith.constant 20 : index
    %98 = vector.load %arg2[%c0_91, %c0_92, %c20_93] : memref<1x3x384xf32, #tpu.memory_space<vmem>>, vector<1x3x288xf32>
    %99 = vector.shape_cast %98 : vector<1x3x288xf32> to vector<3x288xf32>
    %c5_94 = arith.constant 5 : index
    %c0_95 = arith.constant 0 : index
    %c0_96 = arith.constant 0 : index
    %100 = vector.load %arg4[%c5_94, %c0_95, %c0_96] : memref<9x3x3xf32, #tpu.memory_space<vmem>>, vector<1x3x3xf32>
    %101 = vector.shape_cast %100 : vector<1x3x3xf32> to vector<3x3xf32>
    %cst_97 = arith.constant dense<0.000000e+00> : vector<3x288xf32>
    %102 = tpu.matmul %101, %99, %cst_97 {dimension_numbers = #tpu.dot_dimension_numbers<[1], [0], [0], [1], [0, 0, 1, 1], [], []>} : vector<3x3xf32>, vector<3x288xf32>, vector<3x288xf32> -> vector<3x288xf32>
    %103 = arith.addf %97, %102 : vector<3x288xf32>
    %c0_98 = arith.constant 0 : index
    %c0_99 = arith.constant 0 : index
    %c36_100 = arith.constant 36 : index
    %104 = vector.load %arg2[%c0_98, %c0_99, %c36_100] : memref<1x3x384xf32, #tpu.memory_space<vmem>>, vector<1x3x288xf32>
    %105 = vector.shape_cast %104 : vector<1x3x288xf32> to vector<3x288xf32>
    %c6_101 = arith.constant 6 : index
    %c0_102 = arith.constant 0 : index
    %c0_103 = arith.constant 0 : index
    %106 = vector.load %arg4[%c6_101, %c0_102, %c0_103] : memref<9x3x3xf32, #tpu.memory_space<vmem>>, vector<1x3x3xf32>
    %107 = vector.shape_cast %106 : vector<1x3x3xf32> to vector<3x3xf32>
    %cst_104 = arith.constant dense<0.000000e+00> : vector<3x288xf32>
    %108 = tpu.matmul %107, %105, %cst_104 {dimension_numbers = #tpu.dot_dimension_numbers<[1], [0], [0], [1], [0, 0, 1, 1], [], []>} : vector<3x3xf32>, vector<3x288xf32>, vector<3x288xf32> -> vector<3x288xf32>
    %109 = arith.addf %103, %108 : vector<3x288xf32>
    %c0_105 = arith.constant 0 : index
    %c0_106 = arith.constant 0 : index
    %c37_107 = arith.constant 37 : index
    %110 = vector.load %arg2[%c0_105, %c0_106, %c37_107] : memref<1x3x384xf32, #tpu.memory_space<vmem>>, vector<1x3x288xf32>
    %111 = vector.shape_cast %110 : vector<1x3x288xf32> to vector<3x288xf32>
    %c7_108 = arith.constant 7 : index
    %c0_109 = arith.constant 0 : index
    %c0_110 = arith.constant 0 : index
    %112 = vector.load %arg4[%c7_108, %c0_109, %c0_110] : memref<9x3x3xf32, #tpu.memory_space<vmem>>, vector<1x3x3xf32>
    %113 = vector.shape_cast %112 : vector<1x3x3xf32> to vector<3x3xf32>
    %cst_111 = arith.constant dense<0.000000e+00> : vector<3x288xf32>
    %114 = tpu.matmul %113, %111, %cst_111 {dimension_numbers = #tpu.dot_dimension_numbers<[1], [0], [0], [1], [0, 0, 1, 1], [], []>} : vector<3x3xf32>, vector<3x288xf32>, vector<3x288xf32> -> vector<3x288xf32>
    %115 = arith.addf %109, %114 : vector<3x288xf32>
    %c0_112 = arith.constant 0 : index
    %c0_113 = arith.constant 0 : index
    %c38_114 = arith.constant 38 : index
    %116 = vector.load %arg2[%c0_112, %c0_113, %c38_114] : memref<1x3x384xf32, #tpu.memory_space<vmem>>, vector<1x3x288xf32>
    %117 = vector.shape_cast %116 : vector<1x3x288xf32> to vector<3x288xf32>
    %c8_115 = arith.constant 8 : index
    %c0_116 = arith.constant 0 : index
    %c0_117 = arith.constant 0 : index
    %118 = vector.load %arg4[%c8_115, %c0_116, %c0_117] : memref<9x3x3xf32, #tpu.memory_space<vmem>>, vector<1x3x3xf32>
    %119 = vector.shape_cast %118 : vector<1x3x3xf32> to vector<3x3xf32>
    %cst_118 = arith.constant dense<0.000000e+00> : vector<3x288xf32>
    %120 = tpu.matmul %119, %117, %cst_118 {dimension_numbers = #tpu.dot_dimension_numbers<[1], [0], [0], [1], [0, 0, 1, 1], [], []>} : vector<3x3xf32>, vector<3x288xf32>, vector<3x288xf32> -> vector<3x288xf32>
    %121 = arith.addf %115, %120 : vector<3x288xf32>
    %c0_119 = arith.constant 0 : index
    %c0_120 = arith.constant 0 : index
    %122 = vector.load %arg6[%c0_119, %c0_120] : memref<3x1xf32, #tpu.memory_space<vmem>>, vector<3x1xf32>
    %123 = vector.broadcast %122 : vector<3x1xf32> to vector<3x288xf32>
    %124 = arith.addf %121, %123 : vector<3x288xf32>
    %cst_121 = arith.constant 0.000000e+00 : f32
    %125 = vector.broadcast %cst_121 : f32 to vector<3x288xf32>
    %126 = arith.subf %125, %124 : vector<3x288xf32>
    %127 = math.exp %126 : vector<3x288xf32>
    %cst_122 = arith.constant 1.000000e+00 : f32
    %128 = vector.broadcast %cst_122 : f32 to vector<3x288xf32>
    %129 = arith.addf %128, %127 : vector<3x288xf32>
    %130 = tpu.reciprocal %129 {approx = true} : vector<3x288xf32> -> vector<3x288xf32>
    %c0_123 = arith.constant 0 : index
    %c0_124 = arith.constant 0 : index
    %c0_125 = arith.constant 0 : index
    %131 = vector.load %arg8[%c0_123, %c0_124, %c0_125] : memref<1x3x288xf32, #tpu.memory_space<vmem>>, vector<1x3x288xf32>
    %132 = vector.shape_cast %131 : vector<1x3x288xf32> to vector<3x288xf32>
    %133 = vector.shape_cast %130 : vector<3x288xf32> to vector<1x3x288xf32>
    tpu.vector_store %arg8[%c0_123, %c0_124, %c0_125], %133 {strides = array<i32>} : memref<1x3x288xf32, #tpu.memory_space<vmem>>, vector<1x3x288xf32>,
    return
  }
  func.func @transform_0(%arg0: i32) -> (i32, i32, i32) {
    %c0_i32 = arith.constant 0 : i32
    %c0_i32_0 = arith.constant 0 : i32
    %c0_i32_1 = arith.constant 0 : i32
    return %arg0, %c0_i32, %c0_i32_0 : i32, i32, i32
  }
  func.func @transform_1(%arg0: i32) -> (i32, i32, i32) {
    %c0_i32 = arith.constant 0 : i32
    %c0_i32_0 = arith.constant 0 : i32
    %c0_i32_1 = arith.constant 0 : i32
    return %arg0, %c0_i32, %c0_i32_0 : i32, i32, i32
  }
  func.func @transform_2(%arg0: i32) -> (i32, i32, i32) {
    %c0_i32 = arith.constant 0 : i32
    %c0_i32_0 = arith.constant 0 : i32
    %c0_i32_1 = arith.constant 0 : i32
    %c0_i32_2 = arith.constant 0 : i32
    return %c0_i32, %c0_i32_0, %c0_i32_1 : i32, i32, i32
  }
  func.func @transform_3(%arg0: i32) -> (i32, i32, i32) {
    %c0_i32 = arith.constant 0 : i32
    %c0_i32_0 = arith.constant 0 : i32
    %c0_i32_1 = arith.constant 0 : i32
    %c0_i32_2 = arith.constant 0 : i32
    return %c0_i32, %c0_i32_0, %c0_i32_1 : i32, i32, i32
  }
  func.func @transform_4(%arg0: i32) -> (i32, i32) {
    %c0_i32 = arith.constant 0 : i32
    %c0_i32_0 = arith.constant 0 : i32
    %c0_i32_1 = arith.constant 0 : i32
    return %c0_i32, %c0_i32_0 : i32, i32
  }
  func.func @transform_5(%arg0: i32) -> (i32, i32) {
    %c0_i32 = arith.constant 0 : i32
    %c0_i32_0 = arith.constant 0 : i32
    %c0_i32_1 = arith.constant 0 : i32
    return %c0_i32, %c0_i32_0 : i32, i32
  }
  func.func @transform_6(%arg0: i32) -> (i32, i32, i32) {
    %c0_i32 = arith.constant 0 : i32
    %c0_i32_0 = arith.constant 0 : i32
    %c0_i32_1 = arith.constant 0 : i32
    return %arg0, %c0_i32, %c0_i32_0 : i32, i32, i32
  }
  func.func @transform_7(%arg0: i32) -> (i32, i32, i32) {
    %c0_i32 = arith.constant 0 : i32
    %c0_i32_0 = arith.constant 0 : i32
    %c0_i32_1 = arith.constant 0 : i32
    return %arg0, %c0_i32, %c0_i32_0 : i32, i32, i32
  }
}

</mosaic_0001>

<bundles_post_ra>
// kernel: ytmt_out_forward.1
= control target key start
LH: loop header
LB: loop body
LE: loop exit
PB: predicated region body
PF: predicated region fallthrough
CT: control target
= control target key end

     0   :  { %s3831_s24 = smov 0   ;;  %s4228_s0 = inlined_call_operand.vmem [shape: f32[2,3,384], index: 0, kind: input, shape index: {}]   ;;  %s4229_s1 = inlined_call_operand.vmem [shape: f32[2,3,384], index: 1, kind: input, shape index: {}]   ;;  %s4230_s2 = inlined_call_operand.vmem [shape: f32[9,3,3], index: 2, kind: input, shape index: {}]   ;;  %s4231_s3 = inlined_call_operand.vmem [shape: f32[9,3,3], index: 3, kind: input, shape index: {}]   ;;  %s4232_s4 = inlined_call_operand.vmem [shape: f32[3,1], index: 4, kind: input, shape index: {}]   ;;  %s4233_s5 = inlined_call_operand.vmem [shape: f32[3,1], index: 5, kind: input, shape index: {}]   ;;  %s4234_s6 = inlined_call_operand.vmem [shape: f32[2,3,288], index: 6, kind: output, shape index: {0}]   ;;  %s4235_s7 = inlined_call_operand.vmem [shape: f32[2,3,288], index: 7, kind: output, shape index: {1}]  }
   0x1 LB: > { %s3467_s25 = sadd.s32 4294967295, %s3778_s24   ;;  %p3471_p0 = scmp.ge.s32.totalorder %s3778_s24, 1  ;;  %s3778_s24 = sphi %s3831_s24, %s18_s24  }
   0x2   : > { %p250_p1 = scmp.lt.s32.totalorder %s3778_s24, 3 }
   0x4   : > { %p251_p2 = pnand %p3471_p0, %p250_p1 }
   0x5   : > { %p292_p3 = scmp.lt.s32.totalorder (!%p251_p2), %s3467_s25, 1  ;;  %s3782_s30 = smov (!%p251_p2), 127  }
   0x6   : > { %254 = sbr.rel (%p251_p2) target bundleno = 462 (0x1ce), region = 44  ;;  %s3783_s8 = smov (!%p251_p2), 126  }
   0x7   : > { %s3784_s9 = smov (!%p251_p2), 110   ;;  %s3785_s10 = smov (!%p251_p2), 109  }
   0x8   : > { %s3786_s11 = smov (!%p251_p2), 108   ;;  %s3787_s12 = smov (!%p251_p2), 92  }
   0x9   : > { %s3788_s13 = smov (!%p251_p2), 91   ;;  %s3789_s17 = smov (!%p251_p2), 90  }
   0xb   : > { %v3780_v0 = vmov 0.0   ;;  %vm3781_vm0 = vmmov 0   ;;  %s4237_s25 = smov (!%p292_p3, %s3467_s25), 1  ;;  %v3790_v47 = vmov 0   ;;  %v1814_v50 = vld [vmem:[%s4232_s4] sm:$0x7] }
   0xc   : > { %3620 = vmatprep.subr.mxu1 %v3780_v0  ;;  %3622 = vmatprep.mubr.msk.f32.mxu1 %vm3781_vm0, %v3780_v0  ;;  %s3843_s26 = smul.u32 12, %s4237_s25  ;;  %v3337_v51 = vld [vmem:[%s4233_s5] sm:$0x7]  ;;  %vm333_vm1 = vcmask 1042432   ;;  %v3476_v52 = vld [vmem:[%s4230_s2 + $0x4] sm:$0x7] }
   0xd   : > { %404 = vmatprep.mubr.f32.mxu0 %v3780_v0  ;;  %3730 = vset.pattern.permute.xlu0 %v3790_v47  ;;  %vm329_vm2 = vcmask 23552   ;;  %v314_v55 = vld [vmem:[%s4230_s2] sm:$0x7]  ;;  %vm326_vm3 = vcmask 1039360   ;;  %v3487_v58 = vld [vmem:[%s4230_s2 + $0x8] sm:$0x7] }
   0xe   : > { %s3849_s29 = scalar_lea.vmem %s4228_s0, %s3843_s26  ;;  %s3901_s16 = scalar_lea.vmem %s4229_s1, %s3843_s26  ;;  %3731 = vset.pattern.permute.xlu1 %v3790_v47  ;;  %vm644_vm4 = vcmask 1031168   ;;  %vm813_vm5 = vcmask 900096   ;;  %vm982_vm6 = vcmask 891904   ;;  %vm1151_vm7 = vcmask 883712  }
   0xf   : > { %v3852_v1 = vld [vmem:[%s3849_s29 + $0x8] sm:$0x7]  ;;  %v3855_v2 = vld [vmem:[%s3849_s29] sm:$0x77]  ;;  %vm1320_vm8 = vcmask 752640   ;;  %vm1489_vm9 = vcmask 744448   ;;  %s306_s18 = scalar_lea.vmem %s4234_s6, %s3843_s26  ;;  %s311_s21 = scalar_lea.vmem %s4235_s7, %s3843_s26 }
  0x10   : > { %324 = vrot.lane.b32.xlu0 %v3852_v1, %s3782_s30  ;;  %320 = vrot.lane.b32.xlu1 %v3855_v2, %s3782_s30  ;;  %v632_v3 = vld [vmem:[%s3849_s29 + $0x8] sm:$0x7]  ;;  %v631_v4 = vld [vmem:[%s3849_s29] sm:$0x77]  ;;  %v3867_v6 = vcombine.high %v3855_v2, %v3855_v2  ;;  %vm1658_vm10 = vcmask 736256   ;;  %vm1843_vm11 = vcmask 256000  }
  0x11   : > { %v637_v5 = vcombine.high %v631_v4, %v631_v4  ;;  %v800_v7 = vld [vmem:[%s3849_s29] sm:$0x77]  ;;  %v801_v9 = vld [vmem:[%s3849_s29 + $0x8] sm:$0x7] }
  0x12   : > { %v806_v8 = vcombine.high %v800_v7, %v800_v7  ;;  %v969_v10 = vld [vmem:[%s3849_s29] sm:$0x77]  ;;  %v970_v12 = vld [vmem:[%s3849_s29 + $0x8] sm:$0x7] }
  0x13   : > { %v975_v11 = vcombine.high %v969_v10, %v969_v10  ;;  %v1138_v13 = vld [vmem:[%s3849_s29] sm:$0x77]  ;;  %v1139_v15 = vld [vmem:[%s3849_s29 + $0x8] sm:$0x7] }
  0x14   : > { %642 = vrot.lane.b32.xlu0 %v632_v3, %s3783_s8  ;;  %638 = vrot.lane.b32.xlu1 %v631_v4, %s3783_s8  ;;  %v1144_v14 = vcombine.high %v1138_v13, %v1138_v13  ;;  %v1307_v16 = vld [vmem:[%s3849_s29] sm:$0x77]  ;;  %v1308_v18 = vld [vmem:[%s3849_s29 + $0x8] sm:$0x7] }
  0x15   : > { %v1313_v17 = vcombine.high %v1307_v16, %v1307_v16  ;;  %v1476_v19 = vld [vmem:[%s3849_s29] sm:$0x77]  ;;  %v1477_v21 = vld [vmem:[%s3849_s29 + $0x8] sm:$0x7]  ;;  %v3493_v3 = vld [vmem:[%s4230_s2 + $0xc] sm:$0x7] }
  0x16   : > { %v1482_v20 = vcombine.high %v1476_v19, %v1476_v19  ;;  %v1645_v22 = vld [vmem:[%s3849_s29] sm:$0x77]  ;;  %v1646_v24 = vld [vmem:[%s3849_s29 + $0x8] sm:$0x7] }
  0x17   : > { %v1651_v23 = vcombine.high %v1645_v22, %v1645_v22  ;;  %v3907_v25 = vld [vmem:[%s3901_s16] sm:$0x77]  ;;  %v3916_v27 = vld [vmem:[%s3901_s16 + $0x8] sm:$0x7] }
  0x18   : > { %640 = vrot.lane.b32.xlu1 %v637_v5, %s3783_s8  ;;  %322 = vrot.lane.b32.xlu0 %v3867_v6, %s3782_s30  ;;  %v3913_v26 = vcombine.high %v3907_v25, %v3907_v25  ;;  %v2161_v28 = vld [vmem:[%s3901_s16] sm:$0x77]  ;;  %v2162_v30 = vld [vmem:[%s3901_s16 + $0x8] sm:$0x7] }
  0x19   : > { %v2167_v29 = vcombine.high %v2161_v28, %v2161_v28  ;;  %v2329_v31 = vld [vmem:[%s3901_s16] sm:$0x77]  ;;  %v2330_v33 = vld [vmem:[%s3901_s16 + $0x8] sm:$0x7] }
  0x1a   : > { %v2335_v32 = vcombine.high %v2329_v31, %v2329_v31  ;;  %v2497_v34 = vld [vmem:[%s3901_s16] sm:$0x77]  ;;  %v2498_v36 = vld [vmem:[%s3901_s16 + $0x8] sm:$0x7] }
  0x1b   : > { %v2503_v35 = vcombine.high %v2497_v34, %v2497_v34  ;;  %v2665_v37 = vld [vmem:[%s3901_s16] sm:$0x77]  ;;  %v2666_v39 = vld [vmem:[%s3901_s16 + $0x8] sm:$0x7] }
  0x1c   : > { %811 = vrot.lane.b32.xlu1 %v801_v9, %s3784_s9  ;;  %809 = vrot.lane.b32.xlu0 %v806_v8, %s3784_s9  ;;  %v2671_v38 = vcombine.high %v2665_v37, %v2665_v37  ;;  %v2833_v40 = vld [vmem:[%s3901_s16] sm:$0x77]  ;;  %v2834_v42 = vld [vmem:[%s3901_s16 + $0x8] sm:$0x7] }
  0x1d   : > { %v2839_v41 = vcombine.high %v2833_v40, %v2833_v40  ;;  %v3001_v43 = vld [vmem:[%s3901_s16] sm:$0x77]  ;;  %v3002_v45 = vld [vmem:[%s3901_s16 + $0x8] sm:$0x7] }
  0x1e   : > { %v3007_v44 = vcombine.high %v3001_v43, %v3001_v43  ;;  %v3169_v46 = vld [vmem:[%s3901_s16] sm:$0x77]  ;;  %v3170_v49 = vld [vmem:[%s3901_s16 + $0x8] sm:$0x7] }
  0x1f   : > { %v3175_v48 = vcombine.high %v3169_v46, %v3169_v46 }
  0x20   : > { %978 = vrot.lane.b32.xlu1 %v975_v11, %s3785_s10  ;;  %807 = vrot.lane.b32.xlu0 %v800_v7, %s3784_s9  ;;  %v3499_v11 = vld [vmem:[%s4230_s2 + $0x10] sm:$0x7] }
  0x24   : > { %976 = vrot.lane.b32.xlu1 %v969_v10, %s3785_s10  ;;  %980 = vrot.lane.b32.xlu0 %v970_v12, %s3785_s10 }
  0x28   : > { %1149 = vrot.lane.b32.xlu1 %v1139_v15, %s3786_s11  ;;  %1147 = vrot.lane.b32.xlu0 %v1144_v14, %s3786_s11 }
  0x2c   : > { %1316 = vrot.lane.b32.xlu1 %v1313_v17, %s3787_s12  ;;  %1145 = vrot.lane.b32.xlu0 %v1138_v13, %s3786_s11 }
  0x30   : > { %1314 = vrot.lane.b32.xlu1 %v1307_v16, %s3787_s12  ;;  %1318 = vrot.lane.b32.xlu0 %v1308_v18, %s3787_s12  ;;  %v3505_v16 = vld [vmem:[%s4230_s2 + $0x14] sm:$0x7] }
  0x34   : > { %1487 = vrot.lane.b32.xlu1 %v1477_v21, %s3788_s13  ;;  %1485 = vrot.lane.b32.xlu0 %v1482_v20, %s3788_s13 }
  0x38   : > { %1654 = vrot.lane.b32.xlu1 %v1651_v23, %s3789_s17  ;;  %1483 = vrot.lane.b32.xlu0 %v1476_v19, %s3788_s13 }
  0x3c   : > { %1652 = vrot.lane.b32.xlu1 %v1645_v22, %s3789_s17  ;;  %1656 = vrot.lane.b32.xlu0 %v1646_v24, %s3789_s17 }
  0x40   : > { %1857 = vrot.lane.b32.xlu1 %v3916_v27, %s3782_s30  ;;  %1855 = vrot.lane.b32.xlu0 %v3913_v26, %s3782_s30 }
  0x44   : > { %2170 = vrot.lane.b32.xlu1 %v2167_v29, %s3783_s8  ;;  %1853 = vrot.lane.b32.xlu0 %v3907_v25, %s3782_s30 }
  0x48   : > { %2168 = vrot.lane.b32.xlu1 %v2161_v28, %s3783_s8  ;;  %2172 = vrot.lane.b32.xlu0 %v2162_v30, %s3783_s8  ;;  %v3511_v28 = vld [vmem:[%s4230_s2 + $0x18] sm:$0x7] }
  0x4c   : > { %2340 = vrot.lane.b32.xlu1 %v2330_v33, %s3784_s9  ;;  %2338 = vrot.lane.b32.xlu0 %v2335_v32, %s3784_s9 }
  0x50   : > { %2506 = vrot.lane.b32.xlu1 %v2503_v35, %s3785_s10  ;;  %2336 = vrot.lane.b32.xlu0 %v2329_v31, %s3784_s9  ;;  %v3517_v31 = vld [vmem:[%s4230_s2 + $0x1c] sm:$0x7] }
  0x54   : > { %2504 = vrot.lane.b32.xlu1 %v2497_v34, %s3785_s10  ;;  %2508 = vrot.lane.b32.xlu0 %v2498_v36, %s3785_s10  ;;  %v3523_v36 = vld [vmem:[%s4230_s2 + $0x20] sm:$0x7] }
  0x58   : > { %2676 = vrot.lane.b32.xlu1 %v2666_v39, %s3786_s11  ;;  %2674 = vrot.lane.b32.xlu0 %v2671_v38, %s3786_s11 }
  0x5c   : > { %2842 = vrot.lane.b32.xlu1 %v2839_v41, %s3787_s12  ;;  %2672 = vrot.lane.b32.xlu0 %v2665_v37, %s3786_s11  ;;  %v3529_v41 = vld [vmem:[%s4231_s3 + $0x4] sm:$0x7] }
  0x60   : > { %2840 = vrot.lane.b32.xlu1 %v2833_v40, %s3787_s12  ;;  %2844 = vrot.lane.b32.xlu0 %v2834_v42, %s3787_s12 }
  0x64   : > { %3012 = vrot.lane.b32.xlu1 %v3002_v45, %s3788_s13  ;;  %3010 = vrot.lane.b32.xlu0 %v3007_v44, %s3788_s13  ;;  %v1847_v45 = vld [vmem:[%s4231_s3] sm:$0x7] }
  0x68   : > { %3178 = vrot.lane.b32.xlu1 %v3175_v48, %s3789_s17  ;;  %3008 = vrot.lane.b32.xlu0 %v3001_v43, %s3788_s13 }
  0x6c   : > { %3176 = vrot.lane.b32.xlu1 %v3169_v46, %s3789_s17  ;;  %3180 = vrot.lane.b32.xlu0 %v3170_v49, %s3789_s17 }
  0x70   : > { %1817 = vperm.xlu0 %3730, %v1814_v50   ;;  %3340 = vperm.xlu1 %3731, %v3337_v51  }
  0x82   : > { %v325_v53 = vpop.permute.xlu0 %324  ;;  %v321_v54 = vpop.permute.xlu1 %320 }
  0x83   : > { %3621 = vmatpush3.msk.msra.mxu1 %vm333_vm1, %v325_v53 }
  0x84   : > { %3623 = vmatmul.mubr.msk.f32.vlgmr.msra.gmra.mxu1 %vm329_vm2, %v3476_v52  ;;  %3625 = vmatprep.subr.mxu1 %v3780_v0 }
  0x85   : > { %3626 = vmatpush3.msk.msra.mxu1 %vm333_vm1, %v3852_v1  ;;  %3627 = vmatprep.mubr.msk.f32.mxu1 %vm3781_vm0, %v3780_v0 }
  0x86   : > { %v643_v56 = vpop.permute.xlu0 %642  ;;  %v639_v57 = vpop.permute.xlu1 %638  ;;  %3630 = vmatprep.subr.mxu1 %v3780_v0 }
  0x88   : > { %3628 = vmatmul.mubr.msk.f32.vlgmr.msra.gmra.mxu1 %vm329_vm2, %v314_v55 }
  0x89   : > { %3631 = vmatpush3.msk.msra.mxu1 %vm333_vm1, %v643_v56  ;;  %3632 = vmatprep.mubr.msk.f32.mxu1 %vm3781_vm0, %v3780_v0 }
  0x8a   : > { %v641_v59 = vpop.permute.xlu1 %640  ;;  %v323_v60 = vpop.permute.xlu0 %322  ;;  %3635 = vmatprep.subr.mxu1 %v3780_v0 }
  0x8b   : > { %v328_v61 = vsel %vm326_vm3, %v323_v60, %v325_v53  ;;  %v327_v62 = vsel %vm326_vm3, %v321_v54, %v323_v60  ;;  %v646_v4 = vsel %vm644_vm4, %v641_v59, %v643_v56  ;;  %v645_v5 = vsel %vm644_vm4, %v639_v57, %v641_v59  ;;  %v3546_v53 = vld [vmem:[%s4231_s3 + $0xc] sm:$0x7]  ;;  %v3552_v60 = vld [vmem:[%s4231_s3 + $0x10] sm:$0x7] }
  0x8c   : > { %3477 = vmatprep.subr.msk.mxu0 %vm333_vm1, %v328_v61  ;;  %3633 = vmatmul.mubr.msk.f32.vlgmr.msra.gmra.mxu1 %vm329_vm2, %v3487_v58 }
  0x8d   : > { %3478 = vmatpush1.msk.msra.mxu0 %vm333_vm1, %v327_v62  ;;  %3637 = vmatprep.mubr.msk.f32.mxu1 %vm3781_vm0, %v3780_v0 }
  0x8e   : > { %v812_v63 = vpop.permute.xlu1 %811  ;;  %3479 = vmatmul.mubr.msk.f32.vlgmr.msra.gmra.mxu0 %vm329_vm2, %v3476_v52  ;;  %3482 = vmatprep.subr.msk.mxu0 %vm333_vm1, %v3867_v6  ;;  %v810_v1 = vpop.permute.xlu0 %809 }
  0x8f   : > { %3483 = vmatpush1.msk.msra.mxu0 %vm333_vm1, %v3855_v2  ;;  %3636 = vmatpush3.msk.msra.mxu1 %vm333_vm1, %v812_v63  ;;  %v815_v2 = vsel %vm813_vm5, %v810_v1, %v812_v63 }
  0x90   : > { %3488 = vmatprep.subr.msk.mxu0 %vm333_vm1, %v646_v4  ;;  %554 = vmatprep.mubr.f32.mxu0 %v3780_v0 }
  0x91   : > { %3640 = vmatprep.subr.mxu1 %v3780_v0  ;;  %3638 = vmatmul.mubr.msk.f32.vlgmr.msra.gmra.mxu1 %vm329_vm2, %v3493_v3 }
  0x92   : > { %v979_v6 = vpop.permute.xlu1 %978  ;;  %3484 = vmatmul.mubr.msk.f32.vlgmr.msra.gmra.mxu0 %vm329_vm2, %v314_v55  ;;  %v808_v7 = vpop.permute.xlu0 %807  ;;  %3642 = vmatprep.mubr.msk.f32.mxu1 %vm3781_vm0, %v3780_v0 }
  0x93   : > { %3489 = vmatpush1.msk.msra.mxu0 %vm333_vm1, %v645_v5  ;;  %720 = vmatprep.mubr.f32.mxu0 %v3780_v0  ;;  %v814_v8 = vsel %vm813_vm5, %v808_v7, %v810_v1 }
  0x94   : > { %3494 = vmatprep.subr.msk.mxu0 %vm333_vm1, %v815_v2  ;;  %v3564_v2 = vld [vmem:[%s4231_s3 + $0x18] sm:$0x7] }
  0x96   : > { %v977_v9 = vpop.permute.xlu1 %976  ;;  %3490 = vmatmul.mubr.msk.f32.vlgmr.msra.gmra.mxu0 %vm329_vm2, %v3487_v58  ;;  %v981_v10 = vpop.permute.xlu0 %980 }
  0x97   : > { %3495 = vmatpush1.msk.msra.mxu0 %vm333_vm1, %v814_v8  ;;  %v984_v12 = vsel %vm982_vm6, %v979_v6, %v981_v10  ;;  %3641 = vmatpush3.msk.msra.mxu1 %vm333_vm1, %v981_v10  ;;  %v983_v13 = vsel %vm982_vm6, %v977_v9, %v979_v6 }
  0x98   : > { %3500 = vmatprep.subr.msk.mxu0 %vm333_vm1, %v984_v12  ;;  %889 = vmatprep.mubr.f32.mxu0 %v3780_v0  ;;  %v3570_v12 = vld [vmem:[%s4231_s3 + $0x1c] sm:$0x7] }
  0x99   : > { %3645 = vmatprep.subr.mxu1 %v3780_v0  ;;  %3643 = vmatmul.mubr.msk.f32.vlgmr.msra.gmra.mxu1 %vm329_vm2, %v3499_v11 }
  0x9a   : > { %v1150_v14 = vpop.permute.xlu1 %1149  ;;  %3496 = vmatmul.mubr.msk.f32.vlgmr.msra.gmra.mxu0 %vm329_vm2, %v3493_v3  ;;  %v1148_v15 = vpop.permute.xlu0 %1147  ;;  %3647 = vmatprep.mubr.msk.f32.mxu1 %vm3781_vm0, %v3780_v0  ;;  %v3558_v3 = vld [vmem:[%s4231_s3 + $0x14] sm:$0x7] }
  0x9b   : > { %3501 = vmatpush1.msk.msra.mxu0 %vm333_vm1, %v983_v13  ;;  %v1153_v17 = vsel %vm1151_vm7, %v1148_v15, %v1150_v14  ;;  %3646 = vmatpush3.msk.msra.mxu1 %vm333_vm1, %v1150_v14 }
  0x9c   : > { %3506 = vmatprep.subr.msk.mxu0 %vm333_vm1, %v1153_v17  ;;  %1058 = vmatprep.mubr.f32.mxu0 %v3780_v0 }
  0x9d   : > { %3650 = vmatprep.subr.mxu1 %v3780_v0  ;;  %3648 = vmatmul.mubr.msk.f32.vlgmr.msra.gmra.mxu1 %vm329_vm2, %v3505_v16 }
  0x9e   : > { %v1317_v18 = vpop.permute.xlu1 %1316  ;;  %v1146_v19 = vpop.permute.xlu0 %1145  ;;  %3502 = vmatmul.mubr.msk.f32.vlgmr.msra.gmra.mxu0 %vm329_vm2, %v3499_v11  ;;  %3652 = vmatprep.mubr.msk.f32.mxu1 %vm3781_vm0, %v3780_v0 }
  0x9f   : > { %v1152_v20 = vsel %vm1151_vm7, %v1146_v19, %v1148_v15  ;;  %1227 = vmatprep.mubr.f32.mxu0 %v3780_v0  ;;  %v3576_v19 = vld [vmem:[%s4231_s3 + $0x20] sm:$0x7] }
  0xa0   : > { %3507 = vmatpush1.msk.msra.mxu0 %vm333_vm1, %v1152_v20 }
  0xa2   : > { %v1315_v21 = vpop.permute.xlu1 %1314  ;;  %v1319_v22 = vpop.permute.xlu0 %1318  ;;  %3508 = vmatmul.mubr.msk.f32.vlgmr.msra.gmra.mxu0 %vm329_vm2, %v3505_v16 }
  0xa3   : > { %v1321_v23 = vsel %vm1320_vm8, %v1315_v21, %v1317_v18  ;;  %v1322_v24 = vsel %vm1320_vm8, %v1317_v18, %v1319_v22  ;;  %3651 = vmatpush3.msk.msra.mxu1 %vm333_vm1, %v1319_v22  ;;  %1396 = vmatprep.mubr.f32.mxu0 %v3780_v0 }
  0xa4   : > { %3512 = vmatprep.subr.msk.mxu0 %vm333_vm1, %v1322_v24  ;;  %3655 = vmatprep.subr.mxu1 %v3780_v0 }
  0xa5   : > { %3513 = vmatpush1.msk.msra.mxu0 %vm333_vm1, %v1321_v23  ;;  %3653 = vmatmul.mubr.msk.f32.vlgmr.msra.gmra.mxu1 %vm329_vm2, %v3511_v28 }
  0xa6   : > { %v1488_v29 = vpop.permute.xlu1 %1487  ;;  %v1486_v30 = vpop.permute.xlu0 %1485  ;;  %3514 = vmatmul.mubr.msk.f32.vlgmr.msra.gmra.mxu0 %vm329_vm2, %v3511_v28  ;;  %3657 = vmatprep.mubr.msk.f32.mxu1 %vm3781_vm0, %v3780_v0 }
  0xa7   : > { %v1491_v32 = vsel %vm1489_vm9, %v1486_v30, %v1488_v29  ;;  %3656 = vmatpush3.msk.msra.mxu1 %vm333_vm1, %v1488_v29  ;;  %1565 = vmatprep.mubr.f32.mxu0 %v3780_v0 }
  0xa8   : > { %3518 = vmatprep.subr.msk.mxu0 %vm333_vm1, %v1491_v32  ;;  %3660 = vmatprep.subr.mxu1 %v3780_v0 }
  0xa9   : > { %3658 = vmatmul.mubr.msk.f32.vlgmr.msra.gmra.mxu1 %vm329_vm2, %v3517_v31 }
  0xaa   : > { %v1655_v33 = vpop.permute.xlu1 %1654  ;;  %v1484_v34 = vpop.permute.xlu0 %1483  ;;  %3662 = vmatprep.mubr.msk.f32.mxu1 %vm3781_vm0, %v3780_v0 }
  0xab   : > { %v1490_v35 = vsel %vm1489_vm9, %v1484_v34, %v1486_v30 }
  0xac   : > { %3519 = vmatpush1.msk.msra.mxu0 %vm333_vm1, %v1490_v35 }
  0xad   : > { %3520 = vmatmul.mubr.msk.f32.vlgmr.msra.gmra.mxu0 %vm329_vm2, %v3517_v31 }
  0xae   : > { %v1653_v37 = vpop.permute.xlu1 %1652  ;;  %v1657_v38 = vpop.permute.xlu0 %1656  ;;  %1734 = vmatprep.mubr.f32.mxu0 %v3780_v0 }
  0xaf   : > { %v1659_v39 = vsel %vm1658_vm10, %v1653_v37, %v1655_v33  ;;  %v1660_v40 = vsel %vm1658_vm10, %v1655_v33, %v1657_v38  ;;  %3661 = vmatpush3.msk.msra.mxu1 %vm333_vm1, %v1657_v38 }
  0xb0   : > { %3524 = vmatprep.subr.msk.mxu0 %vm333_vm1, %v1660_v40  ;;  %3663 = vmatmul.mubr.msk.f32.vlgmr.msra.gmra.mxu1 %vm329_vm2, %v3523_v36 }
  0xb1   : > { %3525 = vmatpush1.msk.msra.mxu0 %vm333_vm1, %v1659_v39  ;;  %3665 = vmatprep.subr.mxu1 %v3780_v0 }
  0xb2   : > { %v1858_v42 = vpop.permute.xlu1 %1857  ;;  %3526 = vmatmul.mubr.msk.f32.vlgmr.msra.gmra.mxu0 %vm329_vm2, %v3523_v36  ;;  %v1856_v43 = vpop.permute.xlu0 %1855  ;;  %3667 = vmatprep.mubr.msk.f32.mxu1 %vm3781_vm0, %v3780_v0 }
  0xb3   : > { %v1860_v44 = vsel %vm326_vm3, %v1856_v43, %v1858_v42  ;;  %3666 = vmatpush3.msk.msra.mxu1 %vm333_vm1, %v1858_v42  ;;  %1934 = vmatprep.mubr.f32.mxu0 %v3780_v0 }
  0xb4   : > { %3530 = vmatprep.subr.msk.mxu0 %vm333_vm1, %v1860_v44  ;;  %3668 = vmatmul.mubr.msk.f32.vlgmr.msra.gmra.mxu1 %vm329_vm2, %v3529_v41 }
  0xb5   : > { %3670 = vmatprep.subr.mxu1 %v3780_v0  ;;  %3672 = vmatprep.mubr.msk.f32.mxu1 %vm3781_vm0, %v3780_v0 }
  0xb6   : > { %v2171_v46 = vpop.permute.xlu1 %2170  ;;  %v1854_v47 = vpop.permute.xlu0 %1853  ;;  %3671 = vmatpush3.msk.msra.mxu1 %vm333_vm1, %v3916_v27  ;;  %v3540_v27 = vld [vmem:[%s4231_s3 + $0x8] sm:$0x7] }
  0xb7   : > { %v1859_v48 = vsel %vm326_vm3, %v1854_v47, %v1856_v43  ;;  %3675 = vmatprep.subr.mxu1 %v3780_v0 }
  0xb8   : > { %3531 = vmatpush1.msk.msra.mxu0 %vm333_vm1, %v1859_v48  ;;  %3673 = vmatmul.mubr.msk.f32.vlgmr.msra.gmra.mxu1 %vm329_vm2, %v1847_v45 }
  0xb9   : > { %3532 = vmatmul.mubr.msk.f32.vlgmr.msra.gmra.mxu0 %vm329_vm2, %v3529_v41  ;;  %3535 = vmatprep.subr.msk.mxu0 %vm333_vm1, %v3913_v26 }
  0xba   : > { %v2169_v49 = vpop.permute.xlu1 %2168  ;;  %v2173_v50 = vpop.permute.xlu0 %2172  ;;  %3536 = vmatpush1.msk.msra.mxu0 %vm333_vm1, %v3907_v25  ;;  %2084 = vmatprep.mubr.f32.mxu0 %v3780_v0 }
  0xbb   : > { %v2174_v51 = vsel %vm644_vm4, %v2169_v49, %v2171_v46  ;;  %v2175_v52 = vsel %vm644_vm4, %v2171_v46, %v2173_v50  ;;  %3676 = vmatpush3.msk.msra.mxu1 %vm333_vm1, %v2173_v50  ;;  %3677 = vmatprep.mubr.msk.f32.mxu1 %vm3781_vm0, %v3780_v0 }
  0xbc   : > { %3541 = vmatprep.subr.msk.mxu0 %vm333_vm1, %v2175_v52  ;;  %3680 = vmatprep.subr.mxu1 %v3780_v0 }
  0xbd   : > { %3537 = vmatmul.mubr.msk.f32.vlgmr.msra.gmra.mxu0 %vm329_vm2, %v1847_v45  ;;  %3678 = vmatmul.mubr.msk.f32.vlgmr.msra.gmra.mxu1 %vm329_vm2, %v3540_v27 }
  0xbe   : > { %3542 = vmatpush1.msk.msra.mxu0 %vm333_vm1, %v2174_v51  ;;  %v2341_v25 = vpop.permute.xlu1 %2340  ;;  %v2339_v26 = vpop.permute.xlu0 %2338  ;;  %2249 = vmatprep.mubr.f32.mxu0 %v3780_v0 }
  0xbf   : > { %v2343_v54 = vsel %vm813_vm5, %v2339_v26, %v2341_v25  ;;  %3681 = vmatpush3.msk.msra.mxu1 %vm333_vm1, %v2341_v25  ;;  %3682 = vmatprep.mubr.msk.f32.mxu1 %vm3781_vm0, %v3780_v0 }
  0xc0   : > { %3547 = vmatprep.subr.msk.mxu0 %vm333_vm1, %v2343_v54  ;;  %3685 = vmatprep.subr.mxu1 %v3780_v0 }
  0xc1   : > { %3543 = vmatmul.mubr.msk.f32.vlgmr.msra.gmra.mxu0 %vm329_vm2, %v3540_v27  ;;  %3683 = vmatmul.mubr.msk.f32.vlgmr.msra.gmra.mxu1 %vm329_vm2, %v3546_v53 }
  0xc2   : > { %v2507_v55 = vpop.permute.xlu1 %2506  ;;  %v2337_v56 = vpop.permute.xlu0 %2336  ;;  %2417 = vmatprep.mubr.f32.mxu0 %v3780_v0  ;;  %3687 = vmatprep.mubr.msk.f32.mxu1 %vm3781_vm0, %v3780_v0 }
  0xc3   : > { %v2342_v57 = vsel %vm813_vm5, %v2337_v56, %v2339_v26 }
  0xc4   : > { %3548 = vmatpush1.msk.msra.mxu0 %vm333_vm1, %v2342_v57 }
  0xc5   : > { %3549 = vmatmul.mubr.msk.f32.vlgmr.msra.gmra.mxu0 %vm329_vm2, %v3546_v53 }
  0xc6   : > { %v2505_v58 = vpop.permute.xlu1 %2504  ;;  %v2509_v59 = vpop.permute.xlu0 %2508  ;;  %2585 = vmatprep.mubr.f32.mxu0 %v3780_v0 }
  0xc7   : > { %v2510_v61 = vsel %vm982_vm6, %v2505_v58, %v2507_v55  ;;  %v2511_v62 = vsel %vm982_vm6, %v2507_v55, %v2509_v59  ;;  %3686 = vmatpush3.msk.msra.mxu1 %vm333_vm1, %v2509_v59 }
  0xc8   : > { %3553 = vmatprep.subr.msk.mxu0 %vm333_vm1, %v2511_v62  ;;  %3690 = vmatprep.subr.mxu1 %v3780_v0 }
  0xc9   : > { %3554 = vmatpush1.msk.msra.mxu0 %vm333_vm1, %v2510_v61  ;;  %3688 = vmatmul.mubr.msk.f32.vlgmr.msra.gmra.mxu1 %vm329_vm2, %v3552_v60 }
  0xca   : > { %v2677_v63 = vpop.permute.xlu1 %2676  ;;  %3555 = vmatmul.mubr.msk.f32.vlgmr.msra.gmra.mxu0 %vm329_vm2, %v3552_v60  ;;  %v2675_v1 = vpop.permute.xlu0 %2674  ;;  %3692 = vmatprep.mubr.msk.f32.mxu1 %vm3781_vm0, %v3780_v0 }
  0xcb   : > { %v2679_v4 = vsel %vm1151_vm7, %v2675_v1, %v2677_v63  ;;  %3691 = vmatpush3.msk.msra.mxu1 %vm333_vm1, %v2677_v63  ;;  %2753 = vmatprep.mubr.f32.mxu0 %v3780_v0 }
  0xcc   : > { %3559 = vmatprep.subr.msk.mxu0 %vm333_vm1, %v2679_v4  ;;  %3695 = vmatprep.subr.mxu1 %v3780_v0 }
  0xcd   : > { %3693 = vmatmul.mubr.msk.f32.vlgmr.msra.gmra.mxu1 %vm329_vm2, %v3558_v3 }
  0xce   : > { %v2843_v5 = vpop.permute.xlu1 %2842  ;;  %v2673_v6 = vpop.permute.xlu0 %2672  ;;  %3697 = vmatprep.mubr.msk.f32.mxu1 %vm3781_vm0, %v3780_v0 }
  0xcf   : > { %v2678_v7 = vsel %vm1151_vm7, %v2673_v6, %v2675_v1 }
  0xd0   : > { %3560 = vmatpush1.msk.msra.mxu0 %vm333_vm1, %v2678_v7 }
  0xd1   : > { %3561 = vmatmul.mubr.msk.f32.vlgmr.msra.gmra.mxu0 %vm329_vm2, %v3558_v3 }
  0xd2   : > { %v2841_v8 = vpop.permute.xlu1 %2840  ;;  %v2845_v9 = vpop.permute.xlu0 %2844  ;;  %2921 = vmatprep.mubr.f32.mxu0 %v3780_v0 }
  0xd3   : > { %v2846_v10 = vsel %vm1320_vm8, %v2841_v8, %v2843_v5  ;;  %v2847_v11 = vsel %vm1320_vm8, %v2843_v5, %v2845_v9  ;;  %3696 = vmatpush3.msk.msra.mxu1 %vm333_vm1, %v2845_v9 }
  0xd4   : > { %3565 = vmatprep.subr.msk.mxu0 %vm333_vm1, %v2847_v11  ;;  %3698 = vmatmul.mubr.msk.f32.vlgmr.msra.gmra.mxu1 %vm329_vm2, %v3564_v2 }
  0xd5   : > { %3566 = vmatpush1.msk.msra.mxu0 %vm333_vm1, %v2846_v10  ;;  %3700 = vmatprep.subr.mxu1 %v3780_v0 }
  0xd6   : > { %v3013_v13 = vpop.permute.xlu1 %3012  ;;  %3567 = vmatmul.mubr.msk.f32.vlgmr.msra.gmra.mxu0 %vm329_vm2, %v3564_v2  ;;  %v3011_v14 = vpop.permute.xlu0 %3010  ;;  %3702 = vmatprep.mubr.msk.f32.mxu1 %vm3781_vm0, %v3780_v0 }
  0xd7   : > { %v3015_v15 = vsel %vm1489_vm9, %v3011_v14, %v3013_v13  ;;  %3701 = vmatpush3.msk.msra.mxu1 %vm333_vm1, %v3013_v13  ;;  %3089 = vmatprep.mubr.f32.mxu0 %v3780_v0 }
  0xd8   : > { %3571 = vmatprep.subr.msk.mxu0 %vm333_vm1, %v3015_v15  ;;  %3703 = vmatmul.mubr.msk.f32.vlgmr.msra.gmra.mxu1 %vm329_vm2, %v3570_v12 }
  0xd9   : > { %3705 = vmatprep.subr.mxu1 %v3780_v0  ;;  %3707 = vmatprep.mubr.msk.f32.mxu1 %vm3781_vm0, %v3780_v0 }
  0xda   : > { %v3179_v16 = vpop.permute.xlu1 %3178  ;;  %v3009_v17 = vpop.permute.xlu0 %3008 }
  0xdb   : > { %v3014_v18 = vsel %vm1489_vm9, %v3009_v17, %v3011_v14 }
  0xdc   : > { %3572 = vmatpush1.msk.msra.mxu0 %vm333_vm1, %v3014_v18 }
  0xdd   : > { %3573 = vmatmul.mubr.msk.f32.vlgmr.msra.gmra.mxu0 %vm329_vm2, %v3570_v12 }
  0xde   : > { %v3177_v20 = vpop.permute.xlu1 %3176  ;;  %v3181_v21 = vpop.permute.xlu0 %3180  ;;  %3257 = vmatprep.mubr.f32.mxu0 %v3780_v0 }
  0xdf   : > { %v3182_v22 = vsel %vm1658_vm10, %v3177_v20, %v3179_v16  ;;  %v3183_v23 = vsel %vm1658_vm10, %v3179_v16, %v3181_v21  ;;  %3706 = vmatpush3.msk.msra.mxu1 %vm333_vm1, %v3181_v21 }
  0xe0   : > { %3577 = vmatprep.subr.msk.mxu0 %vm333_vm1, %v3183_v23  ;;  %3708 = vmatmul.mubr.msk.f32.vlgmr.msra.gmra.mxu1 %vm329_vm2, %v3576_v19 }
  0xe1   : > { %3578 = vmatpush1.msk.msra.mxu0 %vm333_vm1, %v3182_v22 }
  0xe2   : > { %3579 = vmatmul.mubr.msk.f32.vlgmr.msra.gmra.mxu0 %vm329_vm2, %v3576_v19 }
  0xeb   : > { %v1818_v11 = vpop.permute.xlu0 %1817 }
 0x144   : > { %v477_v24 = vpop.f32.mrf.mxu1 }
 0x146   : > { %v3624_v28 = vpop.f32.mrf.mxu1 }
 0x148   : > { %v627_v29 = vpop.f32.mrf.mxu1 }
 0x149   : > { %v628_v38 = vadd.f32 %v627_v29, %v477_v24 }
 0x14a   : > { %v3629_v30 = vpop.f32.mrf.mxu1 }
 0x14c   : > { %v793_v31 = vpop.f32.mrf.mxu1 }
 0x14d   : > { %v799_v41 = vadd.f32 %v793_v31, %v628_v38 }
 0x14e   : > { %v406_v0 = vpop.f32.mrf.mxu0  ;;  %v3634_v32 = vpop.f32.mrf.mxu1 }
 0x150   : > { %v408_v33 = vpop.f32.mrf.mxu0 }
 0x151   : > { %v962_v34 = vpop.f32.mrf.mxu1 }
 0x152   : > { %v556_v35 = vpop.f32.mrf.mxu0  ;;  %v968_v48 = vadd.f32 %v962_v34, %v799_v41 }
 0x153   : > { %v3639_v36 = vpop.f32.mrf.mxu1  ;;  %v557_v44 = vadd.f32 %v556_v35, %v406_v0 }
 0x154   : > { %v558_v37 = vpop.f32.mrf.mxu0 }
 0x155   : > { %v559_v47 = vadd.f32 %v558_v37, %v408_v33 }
 0x156   : > { %v722_v39 = vpop.f32.mrf.mxu0 }
 0x157   : > { %v797_v27 = vadd.f32 %v722_v39, %v557_v44 }
 0x158   : > { %v724_v40 = vpop.f32.mrf.mxu0 }
 0x159   : > { %v1131_v42 = vpop.f32.mrf.mxu1  ;;  %v798_v25 = vadd.f32 %v724_v40, %v559_v47 }
 0x15a   : > { %v891_v43 = vpop.f32.mrf.mxu0  ;;  %v1137_v26 = vadd.f32 %v1131_v42, %v968_v48 }
 0x15b   : > { %v3644_v45 = vpop.f32.mrf.mxu1  ;;  %v966_v54 = vadd.f32 %v891_v43, %v797_v27 }
 0x15c   : > { %v893_v46 = vpop.f32.mrf.mxu0 }
 0x15d   : > { %v1300_v49 = vpop.f32.mrf.mxu1  ;;  %v967_v56 = vadd.f32 %v893_v46, %v798_v25 }
 0x15e   : > { %v1060_v50 = vpop.f32.mrf.mxu0  ;;  %v1306_v57 = vadd.f32 %v1300_v49, %v1137_v26 }
 0x15f   : > { %v3649_v51 = vpop.f32.mrf.mxu1  ;;  %v1135_v59 = vadd.f32 %v1060_v50, %v966_v54 }
 0x160   : > { %v1062_v52 = vpop.f32.mrf.mxu0 }
 0x161   : > { %v1136_v62 = vadd.f32 %v1062_v52, %v967_v56 }
 0x162   : > { %v1229_v53 = vpop.f32.mrf.mxu0 }
 0x163   : > { %v1304_v3 = vadd.f32 %v1229_v53, %v1135_v59 }
 0x164   : > { %v1231_v55 = vpop.f32.mrf.mxu0 }
 0x165   : > { %v1469_v58 = vpop.f32.mrf.mxu1  ;;  %v1305_v6 = vadd.f32 %v1231_v55, %v1136_v62 }
 0x166   : > { %v1398_v60 = vpop.f32.mrf.mxu0  ;;  %v1475_v63 = vadd.f32 %v1469_v58, %v1306_v57 }
 0x167   : > { %v3654_v61 = vpop.f32.mrf.mxu1  ;;  %v1473_v8 = vadd.f32 %v1398_v60, %v1304_v3 }
 0x168   : > { %v1400_v4 = vpop.f32.mrf.mxu0 }
 0x169   : > { %v1638_v1 = vpop.f32.mrf.mxu1  ;;  %v1474_v12 = vadd.f32 %v1400_v4, %v1305_v6 }
 0x16a   : > { %v1644_v2 = vadd.f32 %v1638_v1, %v1475_v63 }
 0x16b   : > { %v3659_v5 = vpop.f32.mrf.mxu1 }
 0x16d   : > { %v1567_v7 = vpop.f32.mrf.mxu0 }
 0x16e   : > { %v1642_v13 = vadd.f32 %v1567_v7, %v1473_v8 }
 0x16f   : > { %v1569_v9 = vpop.f32.mrf.mxu0 }
 0x170   : > { %v1807_v10 = vpop.f32.mrf.mxu1  ;;  %v1643_v17 = vadd.f32 %v1569_v9, %v1474_v12 }
 0x171   : > { %v1813_v14 = vadd.f32 %v1807_v10, %v1644_v2 }
 0x172   : > { %v1736_v15 = vpop.f32.mrf.mxu0  ;;  %v3664_v16 = vpop.f32.mrf.mxu1 }
 0x173   : > { %v1811_v18 = vadd.f32 %v1736_v15, %v1642_v13  ;;  %v1822_v19 = vadd.f32 %v1818_v11, %v1813_v14 }
 0x174   : > { %v1738_v20 = vpop.f32.mrf.mxu0  ;;  %v2007_v21 = vpop.f32.mrf.mxu1 }
 0x175   : > { %v1812_v22 = vadd.f32 %v1738_v20, %v1643_v17  ;;  %v1820_v23 = vadd.f32 %v1818_v11, %v1811_v18  ;;  %v1825_v24 = vsub.f32 0.0, %v1822_v19 }
 0x176   : > { %v3669_v28 = vpop.f32.mrf.mxu1 }
 0x177   : > { %v1821_v29 = vadd.f32 %v1818_v11, %v1812_v22  ;;  %v1823_v30 = vsub.f32 0.0, %v1820_v23  ;;  %v1830_v31 = vmul.f32 1.442695, %v1825_v24 }
 0x178   : > { %v2157_v0 = vpop.f32.mrf.mxu1 }
 0x179   : > { %v1824_v32 = vsub.f32 0.0, %v1821_v29  ;;  %v1826_v33 = vmul.f32 1.442695, %v1823_v30  ;;  %3748 = vpow2.f32 %v1830_v31  ;;  %v1936_v34 = vpop.f32.mrf.mxu0  ;;  %v2158_v26 = vadd.f32 %v2157_v0, %v2007_v21  ;;  %v3341_v30 = vpop.permute.xlu1 %3340 }
 0x17a   : > { %v3674_v35 = vpop.f32.mrf.mxu1 }
 0x17b   : > { %3750 = vpow2.f32 %v1826_v33  ;;  %v1828_v36 = vmul.f32 1.442695, %v1824_v32  ;;  %v1938_v37 = vpop.f32.mrf.mxu0 }
 0x17d   : > { %3752 = vpow2.f32 %v1828_v36  ;;  %v2086_v38 = vpop.f32.mrf.mxu0  ;;  %v2322_v39 = vpop.f32.mrf.mxu1 }
 0x17e   : > { %v2328_v56 = vadd.f32 %v2322_v39, %v2158_v26  ;;  %v2087_v59 = vadd.f32 %v2086_v38, %v1936_v34 }
 0x17f   : > { %v2088_v40 = vpop.f32.mrf.mxu0  ;;  %v3679_v41 = vpop.f32.mrf.mxu1 }
 0x180   : > { %v2089_v61 = vadd.f32 %v2088_v40, %v1938_v37 }
 0x181   : > { %v2251_v42 = vpop.f32.mrf.mxu0  ;;  %v2490_v43 = vpop.f32.mrf.mxu1 }
 0x182   : > { %v2496_v62 = vadd.f32 %v2490_v43, %v2328_v56  ;;  %v2326_v3 = vadd.f32 %v2251_v42, %v2087_v59 }
 0x183   : > { %v2253_v44 = vpop.f32.mrf.mxu0  ;;  %v3684_v45 = vpop.f32.mrf.mxu1 }
 0x184   : > { %v2327_v6 = vadd.f32 %v2253_v44, %v2089_v61 }
 0x185   : > { %v2419_v46 = vpop.f32.mrf.mxu0 }
 0x186   : > { %v3749_v47 = vpop.eup %3748  ;;  %v2494_v10 = vadd.f32 %v2419_v46, %v2326_v3 }
 0x187   : > { %v1834_v48 = vadd.f32 1.0, %v3749_v47  ;;  %v2421_v49 = vpop.f32.mrf.mxu0 }
 0x188   : > { %v3751_v50 = vpop.eup %3750  ;;  %v2495_v14 = vadd.f32 %v2421_v49, %v2327_v6 }
 0x189   : > { %v1832_v27 = vadd.f32 1.0, %v3751_v50  ;;  %3754 = vrcp.f32 %v1834_v48  ;;  %v2658_v51 = vpop.f32.mrf.mxu1 }
 0x18a   : > { %v3753_v52 = vpop.eup %3752  ;;  %v2587_v53 = vpop.f32.mrf.mxu0  ;;  %v2664_v7 = vadd.f32 %v2658_v51, %v2496_v62 }
 0x18b   : > { %v1833_v25 = vadd.f32 1.0, %v3753_v52  ;;  %v3689_v54 = vpop.f32.mrf.mxu1  ;;  %3756 = vrcp.f32 %v1832_v27  ;;  %v2662_v15 = vadd.f32 %v2587_v53, %v2494_v10 }
 0x18c   : > { %v2589_v57 = vpop.f32.mrf.mxu0 }
 0x18d   : > { %3758 = vrcp.f32 %v1833_v25  ;;  %v2826_v55 = vpop.f32.mrf.mxu1  ;;  %v2663_v18 = vadd.f32 %v2589_v57, %v2495_v14 }
 0x18e   : > { %v2832_v16 = vadd.f32 %v2826_v55, %v2664_v7 }
 0x18f   : > { %v3694_v58 = vpop.f32.mrf.mxu1 }
 0x191   : > { %v2755_v60 = vpop.f32.mrf.mxu0 }
 0x192   : > { %v2830_v19 = vadd.f32 %v2755_v60, %v2662_v15 }
 0x193   : > { %v2757_v63 = vpop.f32.mrf.mxu0 }
 0x194   : > { %v2994_v1 = vpop.f32.mrf.mxu1  ;;  %v2831_v22 = vadd.f32 %v2757_v63, %v2663_v18 }
 0x195   : > { %v3000_v20 = vadd.f32 %v2994_v1, %v2832_v16 }
 0x196   : > { %v3755_v4 = vpop.eup %3754  ;;  %v3699_v5 = vpop.f32.mrf.mxu1 }
 0x197   : > { %1844 = vst.msk [vmem:[%s306_s18 + $0x8] sm:$0x7] %vm1843_vm11, %v3755_v4  ;;  %v2923_v2 = vpop.f32.mrf.mxu0 }
 0x198   : > { %v3162_v8 = vpop.f32.mrf.mxu1  ;;  %v3757_v9 = vpop.eup %3756  ;;  %v2998_v23 = vadd.f32 %v2923_v2, %v2830_v19 }
 0x199   : > { %v2925_v17 = vpop.f32.mrf.mxu0  ;;  %v3168_v24 = vadd.f32 %v3162_v8, %v3000_v20 }
 0x19a   : > { %v3759_v11 = vpop.eup %3758  ;;  %v3704_v12 = vpop.f32.mrf.mxu1  ;;  %v2999_v31 = vadd.f32 %v2925_v17, %v2831_v22 }
 0x19b   : > { %v1840_v13 = vcombine.low %v3757_v9, %v3759_v11 }
 0x19d   : > { %1842 = vst [vmem:[%s306_s18] sm:$0x77] %v1840_v13  ;;  %v3091_v21 = vpop.f32.mrf.mxu0 }
 0x19e   : > { %v3166_v0 = vadd.f32 %v3091_v21, %v2998_v23 }
 0x19f   : > { %v3093_v28 = vpop.f32.mrf.mxu0 }
 0x1a0   : > { %v3330_v29 = vpop.f32.mrf.mxu1  ;;  %v3167_v35 = vadd.f32 %v3093_v28, %v2999_v31 }
 0x1a1   : > { %v3336_v32 = vadd.f32 %v3330_v29, %v3168_v24 }
 0x1a2   : > { %v3259_v33 = vpop.f32.mrf.mxu0  ;;  %v3709_v34 = vpop.f32.mrf.mxu1 }
 0x1a3   : > { %v3345_v36 = vadd.f32 %v3341_v30, %v3336_v32  ;;  %v3334_v37 = vadd.f32 %v3259_v33, %v3166_v0 }
 0x1a4   : > { %v3261_v38 = vpop.f32.mrf.mxu0 }
 0x1a5   : > { %v3348_v39 = vsub.f32 0.0, %v3345_v36  ;;  %v3343_v40 = vadd.f32 %v3341_v30, %v3334_v37  ;;  %v3335_v41 = vadd.f32 %v3261_v38, %v3167_v35 }
 0x1a7   : > { %v3353_v42 = vmul.f32 1.442695, %v3348_v39  ;;  %v3346_v43 = vsub.f32 0.0, %v3343_v40  ;;  %v3344_v44 = vadd.f32 %v3341_v30, %v3335_v41 }
 0x1a9   : > { %3760 = vpow2.f32 %v3353_v42  ;;  %v3349_v45 = vmul.f32 1.442695, %v3346_v43  ;;  %v3347_v46 = vsub.f32 0.0, %v3344_v44 }
 0x1ab   : > { %3762 = vpow2.f32 %v3349_v45  ;;  %v3351_v47 = vmul.f32 1.442695, %v3347_v46 }
 0x1ad   : > { %3764 = vpow2.f32 %v3351_v47 }
 0x1b6   : > { %v3761_v48 = vpop.eup %3760 }
 0x1b7   : > { %v3357_v49 = vadd.f32 1.0, %v3761_v48 }
 0x1b8   : > { %v3763_v50 = vpop.eup %3762 }
 0x1b9   : > { %3766 = vrcp.f32 %v3357_v49  ;;  %v3355_v27 = vadd.f32 1.0, %v3763_v50 }
 0x1ba   : > { %v3765_v51 = vpop.eup %3764 }
 0x1bb   : > { %v3356_v52 = vadd.f32 1.0, %v3765_v51  ;;  %3768 = vrcp.f32 %v3355_v27 }
 0x1bd   : > { %3770 = vrcp.f32 %v3356_v52 }
 0x1c6   : > { %v3767_v25 = vpop.eup %3766 }
 0x1c7   : > { %3366 = vst.msk [vmem:[%s311_s21 + $0x8] sm:$0x7] %vm1843_vm11, %v3767_v25 }
 0x1c8   : > { %v3769_v26 = vpop.eup %3768 }
 0x1ca   : > { %v3771_v53 = vpop.eup %3770 }
 0x1cb   : > { %v3363_v54 = vcombine.low %v3769_v26, %v3771_v53 }
 0x1cd   : > { %3365 = vst [vmem:[%s311_s21] sm:$0x77] %v3363_v54 }
 0x1ce PF: > { %s18_s24 = sadd.s32 1, %s3778_s24  }
 0x1cf   : > { %p15_p4 = scmp.ge.s32.totalorder %s18_s24, 4  }
 0x1d1   :  { %17 = sbr.rel (!%p15_p4) target bundleno = 1 (0x1), region = 105 }

</bundles_post_ra>
